<compile_context>
chip_gen: v5e
topology: v5e:2x2
jax: 0.10.0
libtpu: 0.0.40
codegen_flags: <defaults>
</compile_context>

<pallas_src>
import functools

import jax
import jax.numpy as jnp
from jax.experimental import pallas as pl
from jax.experimental.pallas import tpu as pltpu

D_MODEL = 32
NHEAD = 4
DIM_FF = 64
EPS = 1e-5          # nn.LayerNorm default eps
SLAB_W = 128        # lane width of the packed parameter slab


def _layernorm(x, g, b):
    mu = jnp.mean(x, axis=-1, keepdims=True)
    xc = x - mu
    var = jnp.mean(xc * xc, axis=-1, keepdims=True)
    return xc * jax.lax.rsqrt(var + EPS) * g + b


def encoder_layer_kernel(feat_ref, loc_ref, slab_ref, out_ref, *, batch):
    D, F, H = D_MODEL, DIM_FF, NHEAD
    HD = D // H
    R = 2 * D + F                                  # first LN/bias row in the slab

    x = feat_ref[...]                              # (M, D), M = S*B, seq-major rows
    loc_e = loc_ref[...]                           # (M, D)
    M = x.shape[0]

    ln1_g = slab_ref[R:R + 1, 0:D]
    ln1_b = slab_ref[R:R + 1, D:2 * D]
    ln2_g = slab_ref[R:R + 1, 2 * D:3 * D]
    ln2_b = slab_ref[R:R + 1, 3 * D:4 * D]

    # ---- norm1 ----
    x_n = _layernorm(x, ln1_g, ln1_b)

    # ---- q = k = norm1(feature) + location_embed ; value = norm1(feature) ----
    qk_in = x_n + loc_e
    w_qk = slab_ref[0:D, 0:2 * D]                  # [wq | wk]   (D, 2D)
    b_qk = slab_ref[R + 1:R + 2, 0:2 * D]          # [bq | bk]   (1, 2D)
    qk = jnp.dot(qk_in, w_qk, preferred_element_type=jnp.float32) + b_qk   # (M, 2D)
    w_v = slab_ref[0:D, 2 * D:3 * D]
    b_v = slab_ref[R + 1:R + 2, 2 * D:3 * D]
    v = jnp.dot(x_n, w_v, preferred_element_type=jnp.float32) + b_v        # (M, D)

    # ---- multi-head self-attention over all batch rows at once ----
    # Rows of different batch elements must not attend to each other; with the
    # seq-major flattening the batch id of row i is (i % batch).
    row_b = jax.lax.broadcasted_iota(jnp.int32, (M, M), 0) % batch
    col_b = jax.lax.broadcasted_iota(jnp.int32, (M, M), 1) % batch
    same_batch = row_b == col_b
    neg_big = jnp.float32(-1e30)
    scale = 1.0 / (HD ** 0.5)

    attn_out = jnp.zeros((M, D), jnp.float32)
    for h in range(H):                              # static unroll (H = 4)
        q_h = qk[:, h * HD:(h + 1) * HD] * scale
        k_h = qk[:, D + h * HD:D + (h + 1) * HD]
        v_h = v[:, h * HD:(h + 1) * HD]
        s = jnp.dot(q_h, k_h.T, preferred_element_type=jnp.float32)        # (M, M)
        s = jnp.where(same_batch, s, neg_big)
        m = jnp.max(s, axis=-1, keepdims=True)
        e = jnp.exp(s - m)                          # masked entries underflow to 0
        p = e * pl.reciprocal(jnp.sum(e, axis=-1, keepdims=True), approx=True)
        ctx = jnp.dot(p, v_h, preferred_element_type=jnp.float32)          # (M, HD)
        wo_h = slab_ref[h * HD:(h + 1) * HD, 3 * D:4 * D]                  # (HD, D)
        attn_out = attn_out + jnp.dot(ctx, wo_h, preferred_element_type=jnp.float32)
    attn_out = attn_out + slab_ref[R + 1:R + 2, 3 * D:4 * D]               # + bo

    # ---- residual 1 (dropout1 = identity) ----
    feat1 = x + attn_out

    # ---- norm2 + feed-forward (relu; dropout = identity) ----
    y = _layernorm(feat1, ln2_g, ln2_b)
    w1 = slab_ref[D:2 * D, 0:F]
    b1 = slab_ref[R + 2:R + 3, 0:F]
    w2 = slab_ref[2 * D:2 * D + F, 0:D]
    b2 = slab_ref[R + 2:R + 3, F:F + D]
    h1 = jnp.maximum(jnp.dot(y, w1, preferred_element_type=jnp.float32) + b1, 0.0)
    ffn = jnp.dot(h1, w2, preferred_element_type=jnp.float32) + b2

    # ---- residual 2 (dropout2 = identity) ----
    out_ref[...] = feat1 + ffn


def _pack_params(p):
    """Pack every weight/bias into one lane-dense (rows, 128) f32 slab."""
    D, F = D_MODEL, DIM_FF
    assert 4 * D <= SLAB_W and F + D <= SLAB_W and F <= SLAB_W
    R = 2 * D + F
    n_rows = ((R + 3 + 7) // 8) * 8                 # pad rows to a multiple of 8
    slab = jnp.zeros((n_rows, SLAB_W), jnp.float32)
    slab = slab.at[0:D, 0:D].set(p["wq"])
    slab = slab.at[0:D, D:2 * D].set(p["wk"])
    slab = slab.at[0:D, 2 * D:3 * D].set(p["wv"])
    slab = slab.at[0:D, 3 * D:4 * D].set(p["wo"])
    slab = slab.at[D:2 * D, 0:F].set(p["w1"])
    slab = slab.at[2 * D:2 * D + F, 0:D].set(p["w2"])
    slab = slab.at[R, 0:D].set(p["ln1_g"][0])
    slab = slab.at[R, D:2 * D].set(p["ln1_b"][0])
    slab = slab.at[R, 2 * D:3 * D].set(p["ln2_g"][0])
    slab = slab.at[R, 3 * D:4 * D].set(p["ln2_b"][0])
    slab = slab.at[R + 1, 0:D].set(p["bq"][0])
    slab = slab.at[R + 1, D:2 * D].set(p["bk"][0])
    slab = slab.at[R + 1, 2 * D:3 * D].set(p["bv"][0])
    slab = slab.at[R + 1, 3 * D:4 * D].set(p["bo"][0])
    slab = slab.at[R + 2, 0:F].set(p["b1"][0])
    slab = slab.at[R + 2, F:F + D].set(p["b2"][0])
    return slab


@jax.jit
def transformer_encoder_layer(feature_sbd, location_bs4, p):
    S, B, D = feature_sbd.shape
    F = p["w1"].shape[1]
    assert D == D_MODEL and F == DIM_FF and D % NHEAD == 0

    # Free contiguous view (no transpose, no HBM round-trip): row = s*B + b.
    feat2d = feature_sbd.reshape(S * B, D)
    # Precompute the location embedding for all batches directly in seq-major
    # layout (one tiny XLA einsum) so the kernel never sees the K=4 matmul.
    loc_e = jnp.einsum("bsf,fd->sbd", location_bs4, p["wloc"]) + p["bloc"].reshape(1, 1, D)
    loc2d = loc_e.reshape(S * B, D)

    slab = _pack_params(p)

    kernel = functools.partial(encoder_layer_kernel, batch=B)
    grid_spec = pltpu.PrefetchScalarGridSpec(
        num_scalar_prefetch=0,
        grid=(1,),                                   # whole problem in one step
        in_specs=[
            pl.BlockSpec((S * B, D), lambda i: (0, 0)),     # feature rows
            pl.BlockSpec((S * B, D), lambda i: (0, 0)),     # location embedding rows
            pl.BlockSpec(slab.shape, lambda i: (0, 0)),     # packed parameter slab
        ],
        out_specs=pl.BlockSpec((S * B, D), lambda i: (0, 0)),
    )
    out2d = pl.pallas_call(
        kernel,
        out_shape=jax.ShapeDtypeStruct((S * B, D), jnp.float32),
        grid_spec=grid_spec,
        compiler_params=pltpu.CompilerParams(dimension_semantics=("arbitrary",)),
    )(feat2d, loc2d, slab)

    return out2d.reshape(S, B, D)                    # free reshape back to (S, B, D)


def reference(feature_sbd, location_bs4, p):
    """Pure-JAX reference with identical semantics (PyTorch eval-mode)."""
    x = jnp.transpose(feature_sbd, (1, 0, 2))        # (B, S, D)

    def ln(t, g, b):
        mu = t.mean(-1, keepdims=True)
        var = ((t - mu) ** 2).mean(-1, keepdims=True)
        return (t - mu) / jnp.sqrt(var + EPS) * g + b

    xn = ln(x, p["ln1_g"], p["ln1_b"])
    loc_e = location_bs4 @ p["wloc"] + p["bloc"]
    qk = xn + loc_e
    q = qk @ p["wq"] + p["bq"]
    k = qk @ p["wk"] + p["bk"]
    v = xn @ p["wv"] + p["bv"]
    B, S, D = x.shape
    H, hd = NHEAD, D // NHEAD
    qh = q.reshape(B, S, H, hd).transpose(0, 2, 1, 3)
    kh = k.reshape(B, S, H, hd).transpose(0, 2, 1, 3)
    vh = v.reshape(B, S, H, hd).transpose(0, 2, 1, 3)
    s = jnp.einsum('bhqd,bhkd->bhqk', qh, kh) / jnp.sqrt(hd)
    a = jax.nn.softmax(s, axis=-1)
    o = jnp.einsum('bhqk,bhkd->bhqd', a, vh).transpose(0, 2, 1, 3).reshape(B, S, D)
    o = o @ p["wo"] + p["bo"]
    f1 = x + o
    y = ln(f1, p["ln2_g"], p["ln2_b"])
    ffn = jnp.maximum(y @ p["w1"] + p["b1"], 0.0) @ p["w2"] + p["b2"]
    out = f1 + ffn
    return jnp.transpose(out, (1, 0, 2))


def make_params(key, d_model=D_MODEL, dim_ff=DIM_FF):
    ks = jax.random.split(key, 18)
    s = 0.1
    f32 = jnp.float32

    def rnd(k, shape, scale=s):
        return (scale * jax.random.normal(k, shape)).astype(f32)

    return {
        "ln1_g": 1.0 + rnd(ks[0], (1, d_model)),
        "ln1_b": rnd(ks[1], (1, d_model)),
        "wloc": rnd(ks[2], (4, d_model)),
        "bloc": rnd(ks[3], (1, d_model)),
        "wq": rnd(ks[4], (d_model, d_model)),
        "bq": rnd(ks[5], (1, d_model)),
        "wk": rnd(ks[6], (d_model, d_model)),
        "bk": rnd(ks[7], (1, d_model)),
        "wv": rnd(ks[8], (d_model, d_model)),
        "bv": rnd(ks[9], (1, d_model)),
        "wo": rnd(ks[10], (d_model, d_model)),
        "bo": rnd(ks[11], (1, d_model)),
        "ln2_g": 1.0 + rnd(ks[12], (1, d_model)),
        "ln2_b": rnd(ks[13], (1, d_model)),
        "w1": rnd(ks[14], (d_model, dim_ff)),
        "b1": rnd(ks[15], (1, dim_ff)),
        "w2": rnd(ks[16], (dim_ff, d_model)),
        "b2": rnd(ks[17], (1, d_model)),
    }


if __name__ == "__main__":
    S, B, D = 8, 2, D_MODEL
    key = jax.random.PRNGKey(0)
    k_feat, k_loc, k_par = jax.random.split(key, 3)

    feature = jax.random.normal(k_feat, (S, B, D), dtype=jnp.float32)   # (seq, batch, d_model)
    location = jax.random.normal(k_loc, (B, S, 4), dtype=jnp.float32)   # (batch, seq, 4)
    params = make_params(k_par)

    out = jax.block_until_ready(transformer_encoder_layer(feature, location, params))
    ref = jax.block_until_ready(reference(feature, location, params))

    assert out.shape == (S, B, D)
    # Tolerance loosened from 1e-4 because the softmax denominator uses
    # pl.reciprocal(..., approx=True); structural errors would be >> this.
    assert jnp.allclose(out, ref, atol=5e-3, rtol=5e-3), "mismatch vs pure-JAX reference"

    print("KERNEL_OK")
</pallas_src>

<mosaic_0001>
module attributes {stable_mosaic.version = 11 : i64} {
  func.func @encoder_layer_kernel(%arg0: i32, %arg1: memref<16x32xf32, #tpu.memory_space<vmem>>, %arg2: memref<16x32xf32, #tpu.memory_space<vmem>>, %arg3: memref<136x128xf32, #tpu.memory_space<vmem>>, %arg4: memref<16x32xf32, #tpu.memory_space<vmem>>) attributes {dimension_semantics = [#tpu.dimension_semantics<arbitrary>], iteration_bounds = array<i64: 1>, scalar_prefetch = 0 : i64, scratch_operands = 0 : i64, tpu.core_type = #tpu.core_type<tc>, window_params = [{pipeline_mode = #tpu.pipeline_mode<synchronous>, transform_indices = @transform_0, window_bounds = array<i64: 16, 32>}, {pipeline_mode = #tpu.pipeline_mode<synchronous>, transform_indices = @transform_1, window_bounds = array<i64: 16, 32>}, {pipeline_mode = #tpu.pipeline_mode<synchronous>, transform_indices = @transform_2, window_bounds = array<i64: 136, 128>}, {pipeline_mode = #tpu.pipeline_mode<synchronous>, transform_indices = @transform_3, window_bounds = array<i64: 16, 32>}]} {
    %c0 = arith.constant 0 : index
    %c0_0 = arith.constant 0 : index
    %0 = vector.load %arg1[%c0, %c0_0] : memref<16x32xf32, #tpu.memory_space<vmem>>, vector<16x32xf32>
    %c0_1 = arith.constant 0 : index
    %c0_2 = arith.constant 0 : index
    %1 = vector.load %arg2[%c0_1, %c0_2] : memref<16x32xf32, #tpu.memory_space<vmem>>, vector<16x32xf32>
    %c128 = arith.constant 128 : index
    %c0_3 = arith.constant 0 : index
    %2 = vector.load %arg3[%c128, %c0_3] : memref<136x128xf32, #tpu.memory_space<vmem>>, vector<1x32xf32>
    %c128_4 = arith.constant 128 : index
    %c32 = arith.constant 32 : index
    %3 = vector.load %arg3[%c128_4, %c32] : memref<136x128xf32, #tpu.memory_space<vmem>>, vector<1x32xf32>
    %c128_5 = arith.constant 128 : index
    %c64 = arith.constant 64 : index
    %4 = vector.load %arg3[%c128_5, %c64] : memref<136x128xf32, #tpu.memory_space<vmem>>, vector<1x32xf32>
    %c128_6 = arith.constant 128 : index
    %c96 = arith.constant 96 : index
    %5 = vector.load %arg3[%c128_6, %c96] : memref<136x128xf32, #tpu.memory_space<vmem>>, vector<1x32xf32>
    %cst = arith.constant dense<0.000000e+00> : vector<16xf32>
    %6 = vector.multi_reduction <add>, %0, %cst [1] : vector<16x32xf32> to vector<16xf32>
    %7 = vector.shape_cast %6 : vector<16xf32> to vector<16x1xf32>
    %cst_7 = arith.constant 3.200000e+01 : f32
    %8 = vector.broadcast %cst_7 : f32 to vector<16x1xf32>
    %9 = arith.divf %7, %8 : vector<16x1xf32>
    %10 = vector.broadcast %9 : vector<16x1xf32> to vector<16x32xf32>
    %11 = arith.subf %0, %10 : vector<16x32xf32>
    %12 = arith.mulf %11, %11 : vector<16x32xf32>
    %cst_8 = arith.constant dense<0.000000e+00> : vector<16xf32>
    %13 = vector.multi_reduction <add>, %12, %cst_8 [1] : vector<16x32xf32> to vector<16xf32>
    %14 = vector.shape_cast %13 : vector<16xf32> to vector<16x1xf32>
    %cst_9 = arith.constant 3.200000e+01 : f32
    %15 = vector.broadcast %cst_9 : f32 to vector<16x1xf32>
    %16 = arith.divf %14, %15 : vector<16x1xf32>
    %cst_10 = arith.constant 9.99999974E-6 : f32
    %17 = vector.broadcast %cst_10 : f32 to vector<16x1xf32>
    %18 = arith.addf %16, %17 : vector<16x1xf32>
    %19 = math.rsqrt %18 : vector<16x1xf32>
    %20 = vector.broadcast %19 : vector<16x1xf32> to vector<16x32xf32>
    %21 = arith.mulf %11, %20 : vector<16x32xf32>
    %22 = vector.broadcast %2 : vector<1x32xf32> to vector<16x32xf32>
    %23 = arith.mulf %21, %22 : vector<16x32xf32>
    %24 = vector.broadcast %3 : vector<1x32xf32> to vector<16x32xf32>
    %25 = arith.addf %23, %24 : vector<16x32xf32>
    %26 = arith.addf %25, %1 : vector<16x32xf32>
    %c0_11 = arith.constant 0 : index
    %c0_12 = arith.constant 0 : index
    %27 = vector.load %arg3[%c0_11, %c0_12] : memref<136x128xf32, #tpu.memory_space<vmem>>, vector<32x64xf32>
    %c129 = arith.constant 129 : index
    %c0_13 = arith.constant 0 : index
    %28 = vector.load %arg3[%c129, %c0_13] : memref<136x128xf32, #tpu.memory_space<vmem>>, vector<1x64xf32>
    %cst_14 = arith.constant dense<0.000000e+00> : vector<16x64xf32>
    %29 = tpu.matmul %26, %27, %cst_14 {dimension_numbers = #tpu.dot_dimension_numbers<[1], [0], [0], [1], [0, 0, 1, 1], [], []>} : vector<16x32xf32>, vector<32x64xf32>, vector<16x64xf32> -> vector<16x64xf32>
    %30 = vector.broadcast %28 : vector<1x64xf32> to vector<16x64xf32>
    %31 = arith.addf %29, %30 : vector<16x64xf32>
    %c0_15 = arith.constant 0 : index
    %c64_16 = arith.constant 64 : index
    %32 = vector.load %arg3[%c0_15, %c64_16] : memref<136x128xf32, #tpu.memory_space<vmem>>, vector<32x32xf32>
    %c129_17 = arith.constant 129 : index
    %c64_18 = arith.constant 64 : index
    %33 = vector.load %arg3[%c129_17, %c64_18] : memref<136x128xf32, #tpu.memory_space<vmem>>, vector<1x32xf32>
    %cst_19 = arith.constant dense<0.000000e+00> : vector<16x32xf32>
    %34 = tpu.matmul %25, %32, %cst_19 {dimension_numbers = #tpu.dot_dimension_numbers<[1], [0], [0], [1], [0, 0, 1, 1], [], []>} : vector<16x32xf32>, vector<32x32xf32>, vector<16x32xf32> -> vector<16x32xf32>
    %35 = vector.broadcast %33 : vector<1x32xf32> to vector<16x32xf32>
    %36 = arith.addf %34, %35 : vector<16x32xf32>
    %37 = tpu.iota {dimensions = array<i32: 0>} : vector<16x16xi32>
    %c2_i32 = arith.constant 2 : i32
    %c0_i32 = arith.constant 0 : i32
    %38 = arith.cmpi eq, %c2_i32, %c0_i32 : i32
    %c1_i32 = arith.constant 1 : i32
    %39 = arith.select %38, %c1_i32, %c2_i32 : i32
    %40 = vector.broadcast %39 : i32 to vector<16x16xi32>
    %41 = arith.remsi %37, %40 : vector<16x16xi32>
    %c0_i32_20 = arith.constant 0 : i32
    %42 = vector.broadcast %c0_i32_20 : i32 to vector<16x16xi32>
    %43 = arith.cmpi ne, %41, %42 : vector<16x16xi32>
    %c0_i32_21 = arith.constant 0 : i32
    %44 = vector.broadcast %c0_i32_21 : i32 to vector<16x16xi32>
    %45 = arith.cmpi slt, %41, %44 : vector<16x16xi32>
    %c0_i32_22 = arith.constant 0 : i32
    %46 = arith.cmpi slt, %39, %c0_i32_22 : i32
    %47 = vector.broadcast %46 : i1 to vector<16x16xi1>
    %48 = vector.broadcast %47 : vector<16x16xi1> to vector<16x16xi1>
    %49 = arith.xori %45, %48 : vector<16x16xi1>
    %50 = arith.andi %49, %43 : vector<16x16xi1>
    %51 = vector.broadcast %39 : i32 to vector<16x16xi32>
    %52 = arith.addi %41, %51 : vector<16x16xi32>
    %53 = arith.select %50, %52, %41 : vector<16x16xi1>, vector<16x16xi32>
    %54 = tpu.iota {dimensions = array<i32: 1>} : vector<16x16xi32>
    %c2_i32_23 = arith.constant 2 : i32
    %c0_i32_24 = arith.constant 0 : i32
    %55 = arith.cmpi eq, %c2_i32_23, %c0_i32_24 : i32
    %c1_i32_25 = arith.constant 1 : i32
    %56 = arith.select %55, %c1_i32_25, %c2_i32_23 : i32
    %57 = vector.broadcast %56 : i32 to vector<16x16xi32>
    %58 = arith.remsi %54, %57 : vector<16x16xi32>
    %c0_i32_26 = arith.constant 0 : i32
    %59 = vector.broadcast %c0_i32_26 : i32 to vector<16x16xi32>
    %60 = arith.cmpi ne, %58, %59 : vector<16x16xi32>
    %c0_i32_27 = arith.constant 0 : i32
    %61 = vector.broadcast %c0_i32_27 : i32 to vector<16x16xi32>
    %62 = arith.cmpi slt, %58, %61 : vector<16x16xi32>
    %c0_i32_28 = arith.constant 0 : i32
    %63 = arith.cmpi slt, %56, %c0_i32_28 : i32
    %64 = vector.broadcast %63 : i1 to vector<16x16xi1>
    %65 = vector.broadcast %64 : vector<16x16xi1> to vector<16x16xi1>
    %66 = arith.xori %62, %65 : vector<16x16xi1>
    %67 = arith.andi %66, %60 : vector<16x16xi1>
    %68 = vector.broadcast %56 : i32 to vector<16x16xi32>
    %69 = arith.addi %58, %68 : vector<16x16xi32>
    %70 = arith.select %67, %69, %58 : vector<16x16xi1>, vector<16x16xi32>
    %71 = arith.cmpi eq, %53, %70 : vector<16x16xi32>
    %cst_29 = arith.constant 0.000000e+00 : f32
    %72 = vector.broadcast %cst_29 : f32 to vector<16x32xf32>
    %73 = vector.extract_strided_slice %31 {offsets = [0, 0], sizes = [16, 8], strides = [1, 1]} : vector<16x64xf32> to vector<16x8xf32>
    %cst_30 = arith.constant 0.353553385 : f32
    %74 = vector.broadcast %cst_30 : f32 to vector<16x8xf32>
    %75 = arith.mulf %73, %74 : vector<16x8xf32>
    %76 = vector.extract_strided_slice %31 {offsets = [0, 32], sizes = [16, 8], strides = [1, 1]} : vector<16x64xf32> to vector<16x8xf32>
    %77 = vector.extract_strided_slice %36 {offsets = [0, 0], sizes = [16, 8], strides = [1, 1]} : vector<16x32xf32> to vector<16x8xf32>
    %78 = tpu.transpose %76, [1, 0] : vector<16x8xf32> -> vector<8x16xf32>
    %cst_31 = arith.constant dense<0.000000e+00> : vector<16x16xf32>
    %79 = tpu.matmul %75, %78, %cst_31 {dimension_numbers = #tpu.dot_dimension_numbers<[1], [0], [0], [1], [0, 0, 1, 1], [], []>} : vector<16x8xf32>, vector<8x16xf32>, vector<16x16xf32> -> vector<16x16xf32>
    %cst_32 = arith.constant -1.000000e+30 : f32
    %80 = vector.broadcast %cst_32 : f32 to vector<16x16xf32>
    %81 = arith.select %71, %79, %80 : vector<16x16xi1>, vector<16x16xf32>
    %cst_33 = arith.constant dense<0xFF800000> : vector<16xf32>
    %82 = vector.multi_reduction <maximumf>, %81, %cst_33 [1] : vector<16x16xf32> to vector<16xf32>
    %83 = vector.shape_cast %82 : vector<16xf32> to vector<16x1xf32>
    %84 = vector.broadcast %83 : vector<16x1xf32> to vector<16x16xf32>
    %85 = arith.subf %81, %84 : vector<16x16xf32>
    %86 = math.exp %85 : vector<16x16xf32>
    %cst_34 = arith.constant dense<0.000000e+00> : vector<16xf32>
    %87 = vector.multi_reduction <add>, %86, %cst_34 [1] : vector<16x16xf32> to vector<16xf32>
    %88 = vector.shape_cast %87 : vector<16xf32> to vector<16x1xf32>
    %89 = tpu.reciprocal %88 {approx = true} : vector<16x1xf32> -> vector<16x1xf32>
    %90 = vector.broadcast %89 : vector<16x1xf32> to vector<16x16xf32>
    %91 = arith.mulf %86, %90 : vector<16x16xf32>
    %cst_35 = arith.constant dense<0.000000e+00> : vector<16x8xf32>
    %92 = tpu.matmul %91, %77, %cst_35 {dimension_numbers = #tpu.dot_dimension_numbers<[1], [0], [0], [1], [0, 0, 1, 1], [], []>} : vector<16x16xf32>, vector<16x8xf32>, vector<16x8xf32> -> vector<16x8xf32>
    %c0_36 = arith.constant 0 : index
    %c96_37 = arith.constant 96 : index
    %93 = vector.load %arg3[%c0_36, %c96_37] : memref<136x128xf32, #tpu.memory_space<vmem>>, vector<8x32xf32>
    %cst_38 = arith.constant dense<0.000000e+00> : vector<16x32xf32>
    %94 = tpu.matmul %92, %93, %cst_38 {dimension_numbers = #tpu.dot_dimension_numbers<[1], [0], [0], [1], [0, 0, 1, 1], [], []>} : vector<16x8xf32>, vector<8x32xf32>, vector<16x32xf32> -> vector<16x32xf32>
    %95 = arith.addf %72, %94 : vector<16x32xf32>
    %96 = vector.extract_strided_slice %31 {offsets = [0, 8], sizes = [16, 8], strides = [1, 1]} : vector<16x64xf32> to vector<16x8xf32>
    %cst_39 = arith.constant 0.353553385 : f32
    %97 = vector.broadcast %cst_39 : f32 to vector<16x8xf32>
    %98 = arith.mulf %96, %97 : vector<16x8xf32>
    %99 = vector.extract_strided_slice %31 {offsets = [0, 40], sizes = [16, 8], strides = [1, 1]} : vector<16x64xf32> to vector<16x8xf32>
    %100 = vector.extract_strided_slice %36 {offsets = [0, 8], sizes = [16, 8], strides = [1, 1]} : vector<16x32xf32> to vector<16x8xf32>
    %101 = tpu.transpose %99, [1, 0] : vector<16x8xf32> -> vector<8x16xf32>
    %cst_40 = arith.constant dense<0.000000e+00> : vector<16x16xf32>
    %102 = tpu.matmul %98, %101, %cst_40 {dimension_numbers = #tpu.dot_dimension_numbers<[1], [0], [0], [1], [0, 0, 1, 1], [], []>} : vector<16x8xf32>, vector<8x16xf32>, vector<16x16xf32> -> vector<16x16xf32>
    %cst_41 = arith.constant -1.000000e+30 : f32
    %103 = vector.broadcast %cst_41 : f32 to vector<16x16xf32>
    %104 = arith.select %71, %102, %103 : vector<16x16xi1>, vector<16x16xf32>
    %cst_42 = arith.constant dense<0xFF800000> : vector<16xf32>
    %105 = vector.multi_reduction <maximumf>, %104, %cst_42 [1] : vector<16x16xf32> to vector<16xf32>
    %106 = vector.shape_cast %105 : vector<16xf32> to vector<16x1xf32>
    %107 = vector.broadcast %106 : vector<16x1xf32> to vector<16x16xf32>
    %108 = arith.subf %104, %107 : vector<16x16xf32>
    %109 = math.exp %108 : vector<16x16xf32>
    %cst_43 = arith.constant dense<0.000000e+00> : vector<16xf32>
    %110 = vector.multi_reduction <add>, %109, %cst_43 [1] : vector<16x16xf32> to vector<16xf32>
    %111 = vector.shape_cast %110 : vector<16xf32> to vector<16x1xf32>
    %112 = tpu.reciprocal %111 {approx = true} : vector<16x1xf32> -> vector<16x1xf32>
    %113 = vector.broadcast %112 : vector<16x1xf32> to vector<16x16xf32>
    %114 = arith.mulf %109, %113 : vector<16x16xf32>
    %cst_44 = arith.constant dense<0.000000e+00> : vector<16x8xf32>
    %115 = tpu.matmul %114, %100, %cst_44 {dimension_numbers = #tpu.dot_dimension_numbers<[1], [0], [0], [1], [0, 0, 1, 1], [], []>} : vector<16x16xf32>, vector<16x8xf32>, vector<16x8xf32> -> vector<16x8xf32>
    %c8 = arith.constant 8 : index
    %c96_45 = arith.constant 96 : index
    %116 = vector.load %arg3[%c8, %c96_45] : memref<136x128xf32, #tpu.memory_space<vmem>>, vector<8x32xf32>
    %cst_46 = arith.constant dense<0.000000e+00> : vector<16x32xf32>
    %117 = tpu.matmul %115, %116, %cst_46 {dimension_numbers = #tpu.dot_dimension_numbers<[1], [0], [0], [1], [0, 0, 1, 1], [], []>} : vector<16x8xf32>, vector<8x32xf32>, vector<16x32xf32> -> vector<16x32xf32>
    %118 = arith.addf %95, %117 : vector<16x32xf32>
    %119 = vector.extract_strided_slice %31 {offsets = [0, 16], sizes = [16, 8], strides = [1, 1]} : vector<16x64xf32> to vector<16x8xf32>
    %cst_47 = arith.constant 0.353553385 : f32
    %120 = vector.broadcast %cst_47 : f32 to vector<16x8xf32>
    %121 = arith.mulf %119, %120 : vector<16x8xf32>
    %122 = vector.extract_strided_slice %31 {offsets = [0, 48], sizes = [16, 8], strides = [1, 1]} : vector<16x64xf32> to vector<16x8xf32>
    %123 = vector.extract_strided_slice %36 {offsets = [0, 16], sizes = [16, 8], strides = [1, 1]} : vector<16x32xf32> to vector<16x8xf32>
    %124 = tpu.transpose %122, [1, 0] : vector<16x8xf32> -> vector<8x16xf32>
    %cst_48 = arith.constant dense<0.000000e+00> : vector<16x16xf32>
    %125 = tpu.matmul %121, %124, %cst_48 {dimension_numbers = #tpu.dot_dimension_numbers<[1], [0], [0], [1], [0, 0, 1, 1], [], []>} : vector<16x8xf32>, vector<8x16xf32>, vector<16x16xf32> -> vector<16x16xf32>
    %cst_49 = arith.constant -1.000000e+30 : f32
    %126 = vector.broadcast %cst_49 : f32 to vector<16x16xf32>
    %127 = arith.select %71, %125, %126 : vector<16x16xi1>, vector<16x16xf32>
    %cst_50 = arith.constant dense<0xFF800000> : vector<16xf32>
    %128 = vector.multi_reduction <maximumf>, %127, %cst_50 [1] : vector<16x16xf32> to vector<16xf32>
    %129 = vector.shape_cast %128 : vector<16xf32> to vector<16x1xf32>
    %130 = vector.broadcast %129 : vector<16x1xf32> to vector<16x16xf32>
    %131 = arith.subf %127, %130 : vector<16x16xf32>
    %132 = math.exp %131 : vector<16x16xf32>
    %cst_51 = arith.constant dense<0.000000e+00> : vector<16xf32>
    %133 = vector.multi_reduction <add>, %132, %cst_51 [1] : vector<16x16xf32> to vector<16xf32>
    %134 = vector.shape_cast %133 : vector<16xf32> to vector<16x1xf32>
    %135 = tpu.reciprocal %134 {approx = true} : vector<16x1xf32> -> vector<16x1xf32>
    %136 = vector.broadcast %135 : vector<16x1xf32> to vector<16x16xf32>
    %137 = arith.mulf %132, %136 : vector<16x16xf32>
    %cst_52 = arith.constant dense<0.000000e+00> : vector<16x8xf32>
    %138 = tpu.matmul %137, %123, %cst_52 {dimension_numbers = #tpu.dot_dimension_numbers<[1], [0], [0], [1], [0, 0, 1, 1], [], []>} : vector<16x16xf32>, vector<16x8xf32>, vector<16x8xf32> -> vector<16x8xf32>
    %c16 = arith.constant 16 : index
    %c96_53 = arith.constant 96 : index
    %139 = vector.load %arg3[%c16, %c96_53] : memref<136x128xf32, #tpu.memory_space<vmem>>, vector<8x32xf32>
    %cst_54 = arith.constant dense<0.000000e+00> : vector<16x32xf32>
    %140 = tpu.matmul %138, %139, %cst_54 {dimension_numbers = #tpu.dot_dimension_numbers<[1], [0], [0], [1], [0, 0, 1, 1], [], []>} : vector<16x8xf32>, vector<8x32xf32>, vector<16x32xf32> -> vector<16x32xf32>
    %141 = arith.addf %118, %140 : vector<16x32xf32>
    %142 = vector.extract_strided_slice %31 {offsets = [0, 24], sizes = [16, 8], strides = [1, 1]} : vector<16x64xf32> to vector<16x8xf32>
    %cst_55 = arith.constant 0.353553385 : f32
    %143 = vector.broadcast %cst_55 : f32 to vector<16x8xf32>
    %144 = arith.mulf %142, %143 : vector<16x8xf32>
    %145 = vector.extract_strided_slice %31 {offsets = [0, 56], sizes = [16, 8], strides = [1, 1]} : vector<16x64xf32> to vector<16x8xf32>
    %146 = vector.extract_strided_slice %36 {offsets = [0, 24], sizes = [16, 8], strides = [1, 1]} : vector<16x32xf32> to vector<16x8xf32>
    %147 = tpu.transpose %145, [1, 0] : vector<16x8xf32> -> vector<8x16xf32>
    %cst_56 = arith.constant dense<0.000000e+00> : vector<16x16xf32>
    %148 = tpu.matmul %144, %147, %cst_56 {dimension_numbers = #tpu.dot_dimension_numbers<[1], [0], [0], [1], [0, 0, 1, 1], [], []>} : vector<16x8xf32>, vector<8x16xf32>, vector<16x16xf32> -> vector<16x16xf32>
    %cst_57 = arith.constant -1.000000e+30 : f32
    %149 = vector.broadcast %cst_57 : f32 to vector<16x16xf32>
    %150 = arith.select %71, %148, %149 : vector<16x16xi1>, vector<16x16xf32>
    %cst_58 = arith.constant dense<0xFF800000> : vector<16xf32>
    %151 = vector.multi_reduction <maximumf>, %150, %cst_58 [1] : vector<16x16xf32> to vector<16xf32>
    %152 = vector.shape_cast %151 : vector<16xf32> to vector<16x1xf32>
    %153 = vector.broadcast %152 : vector<16x1xf32> to vector<16x16xf32>
    %154 = arith.subf %150, %153 : vector<16x16xf32>
    %155 = math.exp %154 : vector<16x16xf32>
    %cst_59 = arith.constant dense<0.000000e+00> : vector<16xf32>
    %156 = vector.multi_reduction <add>, %155, %cst_59 [1] : vector<16x16xf32> to vector<16xf32>
    %157 = vector.shape_cast %156 : vector<16xf32> to vector<16x1xf32>
    %158 = tpu.reciprocal %157 {approx = true} : vector<16x1xf32> -> vector<16x1xf32>
    %159 = vector.broadcast %158 : vector<16x1xf32> to vector<16x16xf32>
    %160 = arith.mulf %155, %159 : vector<16x16xf32>
    %cst_60 = arith.constant dense<0.000000e+00> : vector<16x8xf32>
    %161 = tpu.matmul %160, %146, %cst_60 {dimension_numbers = #tpu.dot_dimension_numbers<[1], [0], [0], [1], [0, 0, 1, 1], [], []>} : vector<16x16xf32>, vector<16x8xf32>, vector<16x8xf32> -> vector<16x8xf32>
    %c24 = arith.constant 24 : index
    %c96_61 = arith.constant 96 : index
    %162 = vector.load %arg3[%c24, %c96_61] : memref<136x128xf32, #tpu.memory_space<vmem>>, vector<8x32xf32>
    %cst_62 = arith.constant dense<0.000000e+00> : vector<16x32xf32>
    %163 = tpu.matmul %161, %162, %cst_62 {dimension_numbers = #tpu.dot_dimension_numbers<[1], [0], [0], [1], [0, 0, 1, 1], [], []>} : vector<16x8xf32>, vector<8x32xf32>, vector<16x32xf32> -> vector<16x32xf32>
    %164 = arith.addf %141, %163 : vector<16x32xf32>
    %c129_63 = arith.constant 129 : index
    %c96_64 = arith.constant 96 : index
    %165 = vector.load %arg3[%c129_63, %c96_64] : memref<136x128xf32, #tpu.memory_space<vmem>>, vector<1x32xf32>
    %166 = vector.broadcast %165 : vector<1x32xf32> to vector<16x32xf32>
    %167 = arith.addf %164, %166 : vector<16x32xf32>
    %168 = arith.addf %0, %167 : vector<16x32xf32>
    %cst_65 = arith.constant dense<0.000000e+00> : vector<16xf32>
    %169 = vector.multi_reduction <add>, %168, %cst_65 [1] : vector<16x32xf32> to vector<16xf32>
    %170 = vector.shape_cast %169 : vector<16xf32> to vector<16x1xf32>
    %cst_66 = arith.constant 3.200000e+01 : f32
    %171 = vector.broadcast %cst_66 : f32 to vector<16x1xf32>
    %172 = arith.divf %170, %171 : vector<16x1xf32>
    %173 = vector.broadcast %172 : vector<16x1xf32> to vector<16x32xf32>
    %174 = arith.subf %168, %173 : vector<16x32xf32>
    %175 = arith.mulf %174, %174 : vector<16x32xf32>
    %cst_67 = arith.constant dense<0.000000e+00> : vector<16xf32>
    %176 = vector.multi_reduction <add>, %175, %cst_67 [1] : vector<16x32xf32> to vector<16xf32>
    %177 = vector.shape_cast %176 : vector<16xf32> to vector<16x1xf32>
    %cst_68 = arith.constant 3.200000e+01 : f32
    %178 = vector.broadcast %cst_68 : f32 to vector<16x1xf32>
    %179 = arith.divf %177, %178 : vector<16x1xf32>
    %cst_69 = arith.constant 9.99999974E-6 : f32
    %180 = vector.broadcast %cst_69 : f32 to vector<16x1xf32>
    %181 = arith.addf %179, %180 : vector<16x1xf32>
    %182 = math.rsqrt %181 : vector<16x1xf32>
    %183 = vector.broadcast %182 : vector<16x1xf32> to vector<16x32xf32>
    %184 = arith.mulf %174, %183 : vector<16x32xf32>
    %185 = vector.broadcast %4 : vector<1x32xf32> to vector<16x32xf32>
    %186 = arith.mulf %184, %185 : vector<16x32xf32>
    %187 = vector.broadcast %5 : vector<1x32xf32> to vector<16x32xf32>
    %188 = arith.addf %186, %187 : vector<16x32xf32>
    %c32_70 = arith.constant 32 : index
    %c0_71 = arith.constant 0 : index
    %189 = vector.load %arg3[%c32_70, %c0_71] : memref<136x128xf32, #tpu.memory_space<vmem>>, vector<32x64xf32>
    %c130 = arith.constant 130 : index
    %c0_72 = arith.constant 0 : index
    %190 = vector.load %arg3[%c130, %c0_72] : memref<136x128xf32, #tpu.memory_space<vmem>>, vector<1x64xf32>
    %c64_73 = arith.constant 64 : index
    %c0_74 = arith.constant 0 : index
    %191 = vector.load %arg3[%c64_73, %c0_74] : memref<136x128xf32, #tpu.memory_space<vmem>>, vector<64x32xf32>
    %c130_75 = arith.constant 130 : index
    %c64_76 = arith.constant 64 : index
    %192 = vector.load %arg3[%c130_75, %c64_76] : memref<136x128xf32, #tpu.memory_space<vmem>>, vector<1x32xf32>
    %cst_77 = arith.constant dense<0.000000e+00> : vector<16x64xf32>
    %193 = tpu.matmul %188, %189, %cst_77 {dimension_numbers = #tpu.dot_dimension_numbers<[1], [0], [0], [1], [0, 0, 1, 1], [], []>} : vector<16x32xf32>, vector<32x64xf32>, vector<16x64xf32> -> vector<16x64xf32>
    %194 = vector.broadcast %190 : vector<1x64xf32> to vector<16x64xf32>
    %195 = arith.addf %193, %194 : vector<16x64xf32>
    %cst_78 = arith.constant 0.000000e+00 : f32
    %196 = vector.broadcast %cst_78 : f32 to vector<16x64xf32>
    %197 = arith.maximumf %195, %196 : vector<16x64xf32>
    %cst_79 = arith.constant dense<0.000000e+00> : vector<16x32xf32>
    %198 = tpu.matmul %197, %191, %cst_79 {dimension_numbers = #tpu.dot_dimension_numbers<[1], [0], [0], [1], [0, 0, 1, 1], [], []>} : vector<16x64xf32>, vector<64x32xf32>, vector<16x32xf32> -> vector<16x32xf32>
    %199 = vector.broadcast %192 : vector<1x32xf32> to vector<16x32xf32>
    %200 = arith.addf %198, %199 : vector<16x32xf32>
    %201 = arith.addf %168, %200 : vector<16x32xf32>
    %c0_80 = arith.constant 0 : index
    %c0_81 = arith.constant 0 : index
    %202 = vector.load %arg4[%c0_80, %c0_81] : memref<16x32xf32, #tpu.memory_space<vmem>>, vector<16x32xf32>
    tpu.vector_store %arg4[%c0_80, %c0_81], %201 {strides = array<i32>} : memref<16x32xf32, #tpu.memory_space<vmem>>, vector<16x32xf32>,
    return
  }
  func.func @transform_0(%arg0: i32) -> (i32, i32) {
    %c0_i32 = arith.constant 0 : i32
    %c0_i32_0 = arith.constant 0 : i32
    %c0_i32_1 = arith.constant 0 : i32
    return %c0_i32, %c0_i32_0 : i32, i32
  }
  func.func @transform_1(%arg0: i32) -> (i32, i32) {
    %c0_i32 = arith.constant 0 : i32
    %c0_i32_0 = arith.constant 0 : i32
    %c0_i32_1 = arith.constant 0 : i32
    return %c0_i32, %c0_i32_0 : i32, i32
  }
  func.func @transform_2(%arg0: i32) -> (i32, i32) {
    %c0_i32 = arith.constant 0 : i32
    %c0_i32_0 = arith.constant 0 : i32
    %c0_i32_1 = arith.constant 0 : i32
    return %c0_i32, %c0_i32_0 : i32, i32
  }
  func.func @transform_3(%arg0: i32) -> (i32, i32) {
    %c0_i32 = arith.constant 0 : i32
    %c0_i32_0 = arith.constant 0 : i32
    %c0_i32_1 = arith.constant 0 : i32
    return %c0_i32, %c0_i32_0 : i32, i32
  }
}

</mosaic_0001>

<bundles_post_ra>
// kernel: transformer_encoder_layer.1
= control target key start
LH: loop header
LB: loop body
LE: loop exit
PB: predicated region body
PF: predicated region fallthrough
CT: control target
= control target key end

     0   :  { %vm20_vm0 = vcmask 261120   ;;  %s1361_s0 = inlined_call_operand.vmem [shape: f32[16,32], index: 0, kind: input, shape index: {}]   ;;  %s1362_s1 = inlined_call_operand.vmem [shape: f32[16,32], index: 1, kind: input, shape index: {}]   ;;  %s1363_s2 = inlined_call_operand.vmem [shape: f32[136,128], index: 2, kind: input, shape index: {}]   ;;  %s1364_s3 = inlined_call_operand.hbm [shape: f32[16,32], index: 3, kind: output, shape index: {}]  }
   0x1   :  { %v1092_v0 = vld [vmem:[%s1361_s0] sm:$0xff] }
   0x2   :  { %v21_v1 = vsel %vm20_vm0, %v1092_v0, 0.0 }
   0x3   :  { %22 = vadd.xlane.f32.xlu0 %v21_v1 }
   0x4   :  { %8 = vsyncpa [#allocation3], 0  ;;  %v1099_v2 = vld [vmem:[%s1361_s0 + $0x8] sm:$0xff]  ;;  %v1056_v4 = vmov 32.0   ;;  %v1106_v7 = vld [vmem:[%s1363_s2 + $0x80] ss:$0 sm:$0xff] }
   0x5   :  { %v24_v3 = vsel %vm20_vm0, %v1099_v2, 0.0  ;;  %988 = vrcp.f32 %v1056_v4  ;;  %s1057_s18 = smov 96   ;;  %v1121_v22 = vld [vmem:[%s1363_s2 + $0x18] sm:$0xff]  ;;  %v1127_v23 = vld [vmem:[%s1363_s2 + $0x10] sm:$0xff]  ;;  %v1133_v24 = vld [vmem:[%s1363_s2 + $0x8] sm:$0xff]  ;;  %s1058_s26 = smov 64  }
   0x6   :  { %76 = vrot.lane.b32.xlu2 %v1106_v7, %s1057_s18  ;;  %107 = vmatpush.msra.mxu0 %v1121_v22  ;;  %v955_v25 = vpack.i.bf16 %v1127_v23, %v1121_v22  ;;  %v1141_v26 = vld [vmem:[%s1363_s2] sm:$0xff]  ;;  %v18_v55 = vld [vmem:[%s1362_s1 + $0x8] sm:$0xff]  ;;  %vm218_vm8 = vcmask 64512   ;;  %vm254_vm10 = vcmask 130048   ;;  %s1060_s6 = smov 120   ;;  %s1061_s7 = smov 72  }
   0x7   :  { %v17_v48 = vld [vmem:[%s1362_s1] sm:$0xff]  ;;  %v960_v63 = vpack.i.bf16 %v1141_v26, %v1133_v24  ;;  %s1059_s1 = smov 88   ;;  %s1062_s8 = smov 112  }
   0x8   :  { %108 = vmatpush.msra.mxu0 %v1127_v23  ;;  %v1160_v58 = vld [vmem:[%s1363_s2 + $0x81] ss:$0 sm:$0xff]  ;;  %s1063_s9 = smov 32   ;;  %s1064_s10 = smov 80  }
   0x9   :  { %s1065_s11 = smov 104   ;;  %s890_s12 = sshll.u32 %s1364_s3, 4  ;;  %s891_s12 = int_to_ptr.hbm [resolvable:$true] %s890_s12 }
   0xa   :  { %109 = vmatpush.msra.mxu0 %v1133_v24  ;;  %s1067_s13 = smov 128   ;;  %s1068_s14 = smov 8  }
   0xb   :  { %25 = vadd.xlane.f32.xlu0 %v24_v3  ;;  %v989_v5 = vpop.eup %988 }
   0xc   :  { %v28_v6 = vmul.f32 32.0, %v989_v5  ;;  %vm32_vm1 = vweird.f32 %v989_v5  ;;  %110 = vmatpush.msra.mxu0 %v1141_v26 }
   0xe   :  { %v29_v8 = vsub.f32 1.0, %v28_v6 }
  0x10   :  { %v30_v9 = vmul.f32 %v989_v5, %v29_v8 }
  0x12   :  { %v31_v10 = vadd.f32 %v989_v5, %v30_v9 }
  0x14   :  { %v1110_v11 = vsel %vm32_vm1, %v989_v5, %v31_v10 }
  0x60   :  { %v77_v45 = vpop.permute.xlu2 %76 }
  0x76   :  { %v23_v12 = vpop.xlane.xlu0 %22 }
  0x77   :  { %v34_v13 = vmul.f32 %v1110_v11, %v23_v12 }
  0x79   :  { %v36_v14 = vsub.f32 %v1092_v0, %v34_v13 }
  0x7b   :  { %v38_v15 = vmul.f32 %v36_v14, %v36_v14 }
  0x7d   :  { %v40_v16 = vsel %vm20_vm0, %v38_v15, 0.0 }
  0x7e   :  { %41 = vadd.xlane.f32.xlu1 %v40_v16  ;;  %v26_v17 = vpop.xlane.xlu0 %25 }
  0x7f   :  { %v35_v18 = vmul.f32 %v1110_v11, %v26_v17 }
  0x81   :  { %v37_v19 = vsub.f32 %v1099_v2, %v35_v18 }
  0x83   :  { %v39_v20 = vmul.f32 %v37_v19, %v37_v19 }
  0x85   :  { %v43_v21 = vsel %vm20_vm0, %v39_v20, 0.0 }
  0x86   :  { %44 = vadd.xlane.f32.xlu1 %v43_v21 }
  0x9f   :  { %956 = vrot.lane.b32.xlu1 %v955_v25, %s1058_s26 }
  0xf1   :  { %v42_v27 = vpop.xlane.xlu1 %41 }
  0xf2   :  { %v46_v28 = vmul.f32 %v42_v27, %v1110_v11 }
  0xf4   :  { %v48_v29 = vadd.f32 1e-05, %v46_v28 }
  0xf6   :  { %990 = vrsqrt.f32 %v48_v29  ;;  %vm56_vm3 = vweird.f32 %v48_v29 }
  0xf9   :  { %v45_v30 = vpop.xlane.xlu1 %44 }
  0xfa   :  { %v47_v31 = vmul.f32 %v45_v30, %v1110_v11 }
  0xfc   :  { %v991_v32 = vpop.eup %990  ;;  %v49_v33 = vadd.f32 1e-05, %v47_v31 }
  0xfd   :  { %v51_v34 = vmul.f32 %v991_v32, %v48_v29  ;;  %vm57_vm2 = vweird.f32 %v991_v32 }
  0xfe   :  { %992 = vrsqrt.f32 %v49_v33  ;;  %vm58_vm4 = vmor %vm56_vm3, %vm57_vm2  ;;  %vm66_vm5 = vweird.f32 %v49_v33  ;;  %vm850_vm3 = vcmask 523264  }
  0xff   :  { %v52_v35 = vmul.f32 %v991_v32, %v51_v34 }
 0x101   :  { %v53_v36 = vmul.f32 0.5, %v52_v35 }
 0x103   :  { %v54_v37 = vsub.f32 1.5, %v53_v36 }
 0x104   :  { %v993_v38 = vpop.eup %992 }
 0x105   :  { %v55_v39 = vmul.f32 %v991_v32, %v54_v37  ;;  %v61_v40 = vmul.f32 %v993_v38, %v49_v33  ;;  %vm67_vm6 = vweird.f32 %v993_v38 }
 0x106   :  { %vm68_vm7 = vmor %vm66_vm5, %vm67_vm6 }
 0x107   :  { %v62_v41 = vmul.f32 %v993_v38, %v61_v40  ;;  %v59_v42 = vsel %vm58_vm4, %v991_v32, %v55_v39 }
 0x108   :  { %v70_v43 = vmul.f32 %v59_v42, %v36_v14  ;;  %v167_v14 = vlaneseq }
 0x109   :  { %v63_v44 = vmul.f32 0.5, %v62_v41 }
 0x10a   :  { %v73_v46 = vmul.f32 %v1106_v7, %v70_v43  ;;  %v168_v15 = vshrl.u32 %v167_v14, 7  ;;  %v195_v16 = vand.u32 127, %v167_v14 }
 0x10b   :  { %v64_v47 = vsub.f32 1.5, %v63_v44 }
 0x10c   :  { %v79_v49 = vadd.f32 %v77_v45, %v73_v46  ;;  %v174_v17 = vand.u32 1, %v168_v15  ;;  %v200_v18 = vand.u32 1, %v195_v16  ;;  %v169_v20 = vadd.s32 8, %v168_v15 }
 0x10d   :  { %v65_v50 = vmul.f32 %v993_v38, %v64_v47 }
 0x10e   :  { %v81_v51 = vadd.f32 %v79_v49, %v17_v48  ;;  %vm1183_vm9 = vcmp.eq.s32.totalorder %v174_v17, %v200_v18  ;;  %v181_v28 = vand.u32 1, %v169_v20 }
 0x10f   :  { %v69_v52 = vsel %vm68_vm7, %v993_v38, %v65_v50 }
 0x110   :  { %v71_v53 = vmul.f32 %v69_v52, %v37_v19  ;;  %902 = vmatmul.msk.f32.vlgmr.msra.gmra.mxu0 %vm20_vm0, %v81_v51  ;;  %vm1190_vm11 = vcmp.eq.s32.totalorder %v181_v28, %v200_v18 }
 0x111   :  { %v957_v1 = vpop.permute.xlu1 %956 }
 0x112   :  { %v74_v54 = vmul.f32 %v1106_v7, %v71_v53  ;;  %v958_v3 = vunpack.i.l.bf16 %v957_v1  ;;  %v959_v4 = vunpack.i.h.bf16 %v957_v1 }
 0x114   :  { %v80_v56 = vadd.f32 %v77_v45, %v74_v54  ;;  %156 = vmatpush.msra.mxu1 %v958_v3 }
 0x116   :  { %v82_v57 = vadd.f32 %v80_v56, %v18_v55  ;;  %157 = vmatpush.msra.mxu1 %v959_v4 }
 0x118   :  { %903 = vmatmul.msk.f32.gmra.mxu0 %vm20_vm0, %v82_v57 }
 0x18d   :  { %v112_v59 = vpop.f32.mrf.mxu0 }
 0x18e   :  { %v1163_v60 = vadd.f32 %v1160_v58, %v112_v59 }
 0x190   :  { %214 = vrot.lane.b32.xlu0 %v1163_v60, %s1057_s18  ;;  %v210_v12 = vmul.f32 0.35355338, %v1163_v60 }
 0x195   :  { %v115_v61 = vpop.f32.mrf.mxu0 }
 0x196   :  { %v1168_v62 = vadd.f32 %v1160_v58, %v115_v61 }
 0x198   :  { %216 = vrot.lane.b32.xlu2 %v1168_v62, %s1057_s18  ;;  %v211_v13 = vmul.f32 0.35355338, %v1168_v62 }
 0x1a0   :  { %961 = vrot.lane.b32.xlu2 %v960_v63, %s1058_s26 }
 0x1f2   :  { %v217_v5 = vpop.permute.xlu2 %216 }
 0x1f3   :  { %906 = vmatpush.xpose.msk.msra.mxu2 %vm218_vm8, %v217_v5 }
 0x1fa   :  { %v962_v6 = vpop.permute.xlu2 %961 }
 0x1fb   :  { %v963_v8 = vunpack.i.l.bf16 %v962_v6  ;;  %v964_v9 = vunpack.i.h.bf16 %v962_v6 }
 0x1fd   :  { %158 = vmatpush.msra.mxu1 %v963_v8 }
 0x1ff   :  { %159 = vmatpush.msra.mxu1 %v964_v9 }
 0x200   :  { %904 = vmatmul.msk.f32.vlgmr.msra.gmra.mxu1 %vm20_vm0, %v79_v49 }
 0x202   :  { %v215_v10 = vpop.permute.xlu0 %214 }
 0x203   :  { %907 = vmatpush.xpose.msk.msra.mxu2 %vm218_vm8, %v215_v10 }
 0x206   :  { %908 = vmatmul.msk.f32.vlgmr.msra.gmra.mxu2 %vm218_vm8, %v210_v12 }
 0x208   :  { %905 = vmatmul.msk.f32.gmra.mxu1 %vm20_vm0, %v80_v56 }
 0x20e   :  { %909 = vmatmul.msk.f32.gmra.mxu2 %vm218_vm8, %v211_v13 }
 0x27d   :  { %v161_v33 = vpop.f32.mrf.mxu1 }
 0x285   :  { %v164_v37 = vpop.f32.mrf.mxu1 }
 0x289   :  { %v246_v21 = vpop.f32.mrf.mxu2 }
 0x28a   :  { %v252_v25 = vsel %vm1183_vm9, %v246_v21, -1e+30 }
 0x28b   :  { %v255_v27 = vsel %vm254_vm10, %v252_v25, -inf }
 0x28c   :  { %256 = vmax.xlane.f32.xlu2 %v255_v27 }
 0x291   :  { %v249_v30 = vpop.f32.mrf.mxu2 }
 0x292   :  { %v253_v31 = vsel %vm1190_vm11, %v249_v30, -1e+30 }
 0x293   :  { %v258_v32 = vsel %vm254_vm10, %v253_v31, -inf }
 0x294   :  { %259 = vmax.xlane.f32.xlu0 %v258_v32 }
 0x2a4   :  { %135 = vrot.lane.b32.xlu2 %v1160_v58, %s1058_s26 }
 0x2ac   :  { %311 = vrot.lane.b32.xlu2 %v1163_v60, %s1059_s1 }
 0x2b4   :  { %307 = vrot.lane.b32.xlu2 %v210_v12, %s1060_s6 }
 0x2bc   :  { %614 = vrot.lane.b32.xlu2 %v1168_v62, %s1061_s7 }
 0x2c4   :  { %612 = vrot.lane.b32.xlu2 %v1163_v60, %s1061_s7 }
 0x2cc   :  { %474 = vrot.lane.b32.xlu2 %v210_v12, %s1062_s8 }
 0x2ff   :  { %v257_v34 = vpop.xlane.xlu2 %256 }
 0x300   :  { %v261_v35 = vsub.f32 %v252_v25, %v257_v34 }
 0x302   :  { %v263_v36 = vmul.f32 1.442695, %v261_v35 }
 0x304   :  { %994 = vpow2.f32 %v263_v36 }
 0x307   :  { %v136_v38 = vpop.permute.xlu2 %135  ;;  %v260_v39 = vpop.xlane.xlu0 %259 }
 0x308   :  { %v162_v40 = vadd.f32 %v161_v33, %v136_v38  ;;  %v165_v41 = vadd.f32 %v164_v37, %v136_v38  ;;  %v262_v42 = vsub.f32 %v253_v31, %v260_v39 }
 0x30a   :  { %v995_v43 = vpop.eup %994  ;;  %v265_v44 = vmul.f32 1.442695, %v262_v42  ;;  %297 = vmatpush.msra.mxu3 %v165_v41  ;;  %v1205_v45 = vpack.i.bf16 %v162_v40, %v165_v41 }
 0x30b   :  { %v267_v46 = vsel %vm254_vm10, %v995_v43, 0.0 }
 0x30c   :  { %996 = vpow2.f32 %v265_v44  ;;  %268 = vadd.xlane.f32.xlu1 %v267_v46  ;;  %298 = vmatpush.msra.mxu3 %v162_v40 }
 0x30f   :  { %v312_v50 = vpop.permute.xlu2 %311 }
 0x312   :  { %v997_v47 = vpop.eup %996 }
 0x313   :  { %v270_v48 = vsel %vm254_vm10, %v997_v47, 0.0 }
 0x314   :  { %271 = vadd.xlane.f32.xlu0 %v270_v48 }
 0x317   :  { %v308_v53 = vpop.permute.xlu2 %307 }
 0x31f   :  { %v615_v56 = vpop.permute.xlu2 %614 }
 0x325   :  { %313 = vrot.lane.b32.xlu1 %v1168_v62, %s1059_s1 }
 0x328   :  { %442 = vrot.lane.b32.xlu0 %v1141_v26, %s1063_s9 }
 0x32d   :  { %480 = vrot.lane.b32.xlu1 %v1168_v62, %s1064_s10 }
 0x330   :  { %309 = vrot.lane.b32.xlu0 %v211_v13, %s1060_s6 }
 0x335   :  { %478 = vrot.lane.b32.xlu1 %v1163_v60, %s1064_s10  ;;  %v613_v60 = vpop.permute.xlu2 %612 }
 0x338   :  { %608 = vrot.lane.b32.xlu0 %v210_v12, %s1065_s11 }
 0x33d   :  { %476 = vrot.lane.b32.xlu1 %v211_v13, %s1062_s8  ;;  %v475_v1 = vpop.permute.xlu2 %474 }
 0x340   :  { %610 = vrot.lane.b32.xlu0 %v211_v13, %s1065_s11 }
 0x37f   :  { %v269_v49 = vpop.xlane.xlu1 %268 }
 0x380   :  { %998 = vrcp.f32 %v269_v49 }
 0x386   :  { %v999_v51 = vpop.eup %998 }
 0x387   :  { %v272_v52 = vpop.xlane.xlu0 %271  ;;  %v275_v26 = vmul.f32 %v999_v51, %v995_v43 }
 0x388   :  { %1000 = vrcp.f32 %v272_v52 }
 0x389   :  { %910 = vmatmul.msk.f32.vlgmr.msra.gmra.mxu3 %vm254_vm10, %v275_v26 }
 0x38e   :  { %v1001_v54 = vpop.eup %1000 }
 0x38f   :  { %v276_v55 = vmul.f32 %v1001_v54, %v997_v47 }
 0x391   :  { %911 = vmatmul.msk.f32.gmra.mxu3 %vm254_vm10, %v276_v55 }
 0x397   :  { %v314_v57 = vpop.permute.xlu1 %313 }
 0x398   :  { %912 = vmatpush.xpose.msk.msrb.mxu3 %vm218_vm8, %v314_v57 }
 0x39a   :  { %v443_v59 = vpop.permute.xlu0 %442 }
 0x39b   :  { %466 = vmatpush.msrb.mxu2 %v443_v59 }
 0x39c   :  { %913 = vmatpush.xpose.msk.msrb.mxu3 %vm218_vm8, %v312_v50 }
 0x39d   :  { %930 = vmatpush.xpose.msk.msra.mxu2 %vm218_vm8, %v615_v56 }
 0x39f   :  { %v481_v61 = vpop.permute.xlu1 %480  ;;  %914 = vmatmul.msk.f32.vlgmr.msrb.gmra.mxu3 %vm218_vm8, %v308_v53 }
 0x3a0   :  { %922 = vmatpush.xpose.msk.msra.mxu3 %vm218_vm8, %v481_v61 }
 0x3a1   :  { %931 = vmatpush.xpose.msk.msra.mxu2 %vm218_vm8, %v613_v60 }
 0x3a2   :  { %v310_v62 = vpop.permute.xlu0 %309 }
 0x3a7   :  { %v479_v63 = vpop.permute.xlu1 %478  ;;  %915 = vmatmul.msk.f32.gmra.mxu3 %vm218_vm8, %v310_v62 }
 0x3a8   :  { %923 = vmatpush.xpose.msk.msra.mxu3 %vm218_vm8, %v479_v63 }
 0x3aa   :  { %v609_v6 = vpop.permute.xlu0 %608 }
 0x3af   :  { %924 = vmatmul.msk.f32.vlgmr.msra.gmra.mxu3 %vm218_vm8, %v475_v1  ;;  %v477_v3 = vpop.permute.xlu1 %476 }
 0x3b2   :  { %v611_v10 = vpop.permute.xlu0 %610 }
 0x3b7   :  { %925 = vmatmul.msk.f32.gmra.mxu3 %vm218_vm8, %v477_v3 }
 0x40c   :  { %v300_v4 = vpop.f32.mrf.mxu3 }
 0x40d   :  { %920 = vmatmul.msk.f32.vlgmr.msrb.gmra.mxu2 %vm218_vm8, %v300_v4 }
 0x414   :  { %v303_v5 = vpop.f32.mrf.mxu3 }
 0x415   :  { %921 = vmatmul.msk.f32.gmra.mxu2 %vm218_vm8, %v303_v5 }
 0x41d   :  { %932 = vmatmul.msk.f32.vlgmr.msra.gmra.mxu2 %vm218_vm8, %v609_v6 }
 0x422   :  { %v340_v8 = vpop.f32.mrf.mxu3 }
 0x423   :  { %v346_v9 = vsel %vm1183_vm9, %v340_v8, -1e+30 }
 0x424   :  { %v348_v12 = vsel %vm254_vm10, %v346_v9, -inf }
 0x425   :  { %349 = vmax.xlane.f32.xlu2 %v348_v12  ;;  %933 = vmatmul.msk.f32.gmra.mxu2 %vm218_vm8, %v611_v10 }
 0x42a   :  { %v343_v13 = vpop.f32.mrf.mxu3 }
 0x42b   :  { %v347_v14 = vsel %vm1190_vm11, %v343_v13, -1e+30 }
 0x42c   :  { %v351_v15 = vsel %vm254_vm10, %v347_v14, -inf }
 0x42d   :  { %352 = vmax.xlane.f32.xlu0 %v351_v15 }
 0x432   :  { %v507_v16 = vpop.f32.mrf.mxu3 }
 0x433   :  { %v513_v17 = vsel %vm1183_vm9, %v507_v16, -1e+30 }
 0x434   :  { %v515_v18 = vsel %vm254_vm10, %v513_v17, -inf }
 0x435   :  { %516 = vmax.xlane.f32.xlu2 %v515_v18  ;;  %v980_v18 = vpack.i.bf16 %v1121_v22, %v1127_v23 }
 0x43a   :  { %v510_v36 = vpop.f32.mrf.mxu3 }
 0x43b   :  { %v514_v39 = vsel %vm1190_vm11, %v510_v36, -1e+30 }
 0x43c   :  { %v518_v43 = vsel %vm254_vm10, %v514_v39, -inf }
 0x490   :  { %v1244_v20 = vpop.f32.mrf.mxu2 }
 0x498   :  { %v350_v21 = vpop.xlane.xlu2 %349  ;;  %v1246_v25 = vpop.f32.mrf.mxu2 }
 0x499   :  { %v354_v27 = vsub.f32 %v346_v9, %v350_v21 }
 0x49b   :  { %v356_v28 = vmul.f32 1.442695, %v354_v27 }
 0x49d   :  { %1002 = vpow2.f32 %v356_v28 }
 0x4a0   :  { %v641_v30 = vpop.f32.mrf.mxu2  ;;  %v353_v31 = vpop.xlane.xlu0 %352 }
 0x4a1   :  { %v647_v32 = vsel %vm1183_vm9, %v641_v30, -1e+30  ;;  %v355_v33 = vsub.f32 %v347_v14, %v353_v31 }
 0x4a2   :  { %v649_v34 = vsel %vm254_vm10, %v647_v32, -inf }
 0x4a3   :  { %v1003_v35 = vpop.eup %1002  ;;  %650 = vmax.xlane.f32.xlu1 %v649_v34  ;;  %v358_v38 = vmul.f32 1.442695, %v355_v33 }
 0x4a4   :  { %v360_v37 = vsel %vm254_vm10, %v1003_v35, 0.0 }
 0x4a5   :  { %361 = vadd.xlane.f32.xlu2 %v360_v37  ;;  %1004 = vpow2.f32 %v358_v38 }
 0x4a8   :  { %v517_v40 = vpop.xlane.xlu2 %516  ;;  %v644_v41 = vpop.f32.mrf.mxu2 }
 0x4a9   :  { %v521_v42 = vsub.f32 %v513_v17, %v517_v40  ;;  %v648_v19 = vsel %vm1190_vm11, %v644_v41, -1e+30 }
 0x4aa   :  { %v652_v44 = vsel %vm254_vm10, %v648_v19, -inf }
 0x4ab   :  { %519 = vmax.xlane.f32.xlu1 %v518_v43  ;;  %653 = vmax.xlane.f32.xlu0 %v652_v44  ;;  %v523_v46 = vmul.f32 1.442695, %v521_v42  ;;  %v1005_v47 = vpop.eup %1004 }
 0x4ac   :  { %v363_v48 = vsel %vm254_vm10, %v1005_v47, 0.0 }
 0x4ad   :  { %1006 = vpow2.f32 %v523_v46 }
 0x4b3   :  { %364 = vadd.xlane.f32.xlu1 %v363_v48  ;;  %v1007_v49 = vpop.eup %1006 }
 0x4b4   :  { %v527_v50 = vsel %vm254_vm10, %v1007_v49, 0.0 }
 0x4bb   :  { %528 = vadd.xlane.f32.xlu1 %v527_v50 }
 0x4bf   :  { %966 = vrot.lane.b32.xlu0 %v1205_v45, %s1060_s6 }
 0x4c7   :  { %976 = vrot.lane.b32.xlu0 %v1205_v45, %s1062_s8 }
 0x4cf   :  { %409 = vrot.lane.b32.xlu0 %v1133_v24, %s1063_s9 }
 0x4d7   :  { %740 = vrot.lane.b32.xlu0 %v1160_v58, %s1063_s9 }
 0x516   :  { %v651_v29 = vpop.xlane.xlu1 %650 }
 0x517   :  { %v655_v51 = vsub.f32 %v647_v32, %v651_v29 }
 0x518   :  { %v362_v61 = vpop.xlane.xlu2 %361 }
 0x519   :  { %v657_v52 = vmul.f32 1.442695, %v655_v51 }
 0x51b   :  { %1008 = vpow2.f32 %v657_v52 }
 0x51e   :  { %v654_v26 = vpop.xlane.xlu0 %653  ;;  %v520_v53 = vpop.xlane.xlu1 %519 }
 0x51f   :  { %v656_v54 = vsub.f32 %v648_v19, %v654_v26  ;;  %v522_v57 = vsub.f32 %v514_v39, %v520_v53 }
 0x521   :  { %v1009_v55 = vpop.eup %1008  ;;  %v659_v56 = vmul.f32 1.442695, %v656_v54  ;;  %v525_v60 = vmul.f32 1.442695, %v522_v57 }
 0x522   :  { %v661_v59 = vsel %vm254_vm10, %v1009_v55, 0.0 }
 0x523   :  { %662 = vadd.xlane.f32.xlu2 %v661_v59  ;;  %1010 = vpow2.f32 %v659_v56 }
 0x524   :  { %1012 = vpow2.f32 %v525_v60 }
 0x525   :  { %1014 = vrcp.f32 %v362_v61 }
 0x526   :  { %v365_v62 = vpop.xlane.xlu1 %364 }
 0x527   :  { %1016 = vrcp.f32 %v365_v62 }
 0x529   :  { %v1011_v24 = vpop.eup %1010 }
 0x52a   :  { %v664_v58 = vsel %vm254_vm10, %v1011_v24, 0.0  ;;  %v1013_v63 = vpop.eup %1012 }
 0x52b   :  { %665 = vadd.xlane.f32.xlu1 %v664_v58  ;;  %v1015_v3 = vpop.eup %1014  ;;  %v530_v5 = vsel %vm254_vm10, %v1013_v63, 0.0 }
 0x52c   :  { %v368_v8 = vmul.f32 %v1015_v3, %v1003_v35 }
 0x52d   :  { %v1017_v12 = vpop.eup %1016 }
 0x52e   :  { %v529_v9 = vpop.xlane.xlu1 %528  ;;  %v369_v15 = vmul.f32 %v1017_v12, %v1005_v47 }
 0x52f   :  { %1018 = vrcp.f32 %v529_v9  ;;  %v802_v9 = vld [vmem:[%s1363_s2 + $0x28] sm:$0xff] }
 0x531   :  { %v967_v1 = vpop.permute.xlu0 %966 }
 0x532   :  { %v968_v4 = vunpack.i.l.bf16 %v967_v1  ;;  %v969_v6 = vunpack.i.h.bf16 %v967_v1 }
 0x533   :  { %531 = vadd.xlane.f32.xlu1 %v530_v5 }
 0x534   :  { %398 = vmatpush.msrb.mxu0 %v968_v4 }
 0x535   :  { %v1019_v16 = vpop.eup %1018 }
 0x536   :  { %399 = vmatpush.msrb.mxu0 %v969_v6  ;;  %v535_v17 = vmul.f32 %v1019_v16, %v1007_v49  ;;  %v804_v6 = vld [vmem:[%s1363_s2 + $0x38] sm:$0xff]  ;;  %v987_v16 = vld [vmem:[%s1363_s2 + $0x82] ss:$0 sm:$0xff] }
 0x537   :  { %916 = vmatmul.msk.f32.vlgmr.msrb.gmra.mxu0 %vm254_vm10, %v368_v8  ;;  %v803_v8 = vld [vmem:[%s1363_s2 + $0x30] sm:$0xff] }
 0x539   :  { %v977_v10 = vpop.permute.xlu0 %976 }
 0x53a   :  { %v978_v13 = vunpack.i.l.bf16 %v977_v10  ;;  %v979_v14 = vunpack.i.h.bf16 %v977_v10  ;;  %v801_v10 = vld [vmem:[%s1363_s2 + $0x20] sm:$0xff] }
 0x53b   :  { %971 = vrot.lane.b32.xlu2 %v1205_v45, %s1065_s11 }
 0x53c   :  { %563 = vmatpush.msra.mxu0 %v978_v13 }
 0x53e   :  { %564 = vmatpush.msra.mxu0 %v979_v14  ;;  %v813_v14 = vld [vmem:[%s1363_s2 + $0x78] sm:$0xff] }
 0x53f   :  { %917 = vmatmul.msk.f32.gmra.mxu0 %vm254_vm10, %v369_v15  ;;  %v812_v15 = vld [vmem:[%s1363_s2 + $0x70] sm:$0xff]  ;;  %865 = vmatpush.msrb.mxu2 %v813_v14 }
 0x541   :  { %v410_v21 = vpop.permute.xlu0 %409  ;;  %866 = vmatpush.msrb.mxu2 %v812_v15 }
 0x542   :  { %433 = vmatpush.msrb.mxu1 %v410_v21 }
 0x547   :  { %926 = vmatmul.msk.f32.vlgmr.msra.gmra.mxu0 %vm254_vm10, %v535_v17  ;;  %v811_v17 = vld [vmem:[%s1363_s2 + $0x68] sm:$0xff] }
 0x548   :  { %867 = vmatpush.msrb.mxu2 %v811_v17 }
 0x549   :  { %v741_v51 = vpop.permute.xlu0 %740 }
 0x54c   :  { %981 = vrot.lane.b32.xlu1 %v980_v18, %s1063_s9 }
 0x596   :  { %v663_v27 = vpop.xlane.xlu2 %662 }
 0x597   :  { %1020 = vrcp.f32 %v663_v27  ;;  %v810_v27 = vld [vmem:[%s1363_s2 + $0x60] sm:$0xff] }
 0x598   :  { %868 = vmatpush.msrb.mxu2 %v810_v27 }
 0x59d   :  { %v1021_v28 = vpop.eup %1020 }
 0x59e   :  { %v972_v45 = vpop.permute.xlu2 %971  ;;  %v666_v31 = vpop.xlane.xlu1 %665  ;;  %v669_v33 = vmul.f32 %v1021_v28, %v1009_v55 }
 0x59f   :  { %v973_v30 = vunpack.i.l.bf16 %v972_v45  ;;  %v974_v32 = vunpack.i.h.bf16 %v972_v45  ;;  %1022 = vrcp.f32 %v666_v31  ;;  %v809_v31 = vld [vmem:[%s1363_s2 + $0x58] sm:$0xff] }
 0x5a0   :  { %869 = vmatpush.msrb.mxu2 %v809_v31 }
 0x5a1   :  { %697 = vmatpush.msrb.mxu3 %v973_v30 }
 0x5a3   :  { %698 = vmatpush.msrb.mxu3 %v974_v32 }
 0x5a4   :  { %934 = vmatmul.msk.f32.vlgmr.msrb.gmra.mxu3 %vm254_vm10, %v669_v33 }
 0x5a5   :  { %v1023_v34 = vpop.eup %1022 }
 0x5a6   :  { %v532_v35 = vpop.xlane.xlu1 %531  ;;  %v670_v22 = vmul.f32 %v1023_v34, %v1011_v24 }
 0x5a7   :  { %1024 = vrcp.f32 %v532_v35 }
 0x5ac   :  { %935 = vmatmul.msk.f32.gmra.mxu3 %vm254_vm10, %v670_v22 }
 0x5ad   :  { %v1025_v23 = vpop.eup %1024 }
 0x5ae   :  { %v536_v36 = vmul.f32 %v1025_v23, %v1013_v63 }
 0x5b0   :  { %927 = vmatmul.msk.f32.gmra.mxu0 %vm254_vm10, %v536_v36 }
 0x5b4   :  { %v401_v37 = vpop.f32.mrf.mxu0 }
 0x5b5   :  { %918 = vmatmul.msk.f32.vlgmr.msrb.gmra.mxu1 %vm218_vm8, %v401_v37 }
 0x5bc   :  { %v404_v38 = vpop.f32.mrf.mxu0 }
 0x5bd   :  { %919 = vmatmul.msk.f32.gmra.mxu1 %vm218_vm8, %v404_v38 }
 0x5be   :  { %v982_v39 = vpop.permute.xlu1 %981 }
 0x5bf   :  { %v984_v40 = vunpack.i.h.bf16 %v982_v39  ;;  %v983_v41 = vunpack.i.l.bf16 %v982_v39 }
 0x5c1   :  { %598 = vmatpush.msra.mxu1 %v983_v41  ;;  %730 = vmatpush.msrb.mxu0 %v984_v40 }
 0x5c3   :  { %833 = vmatpush.msrb.mxu1 %v804_v6 }
 0x5c4   :  { %v566_v42 = vpop.f32.mrf.mxu0 }
 0x5c5   :  { %928 = vmatmul.msk.f32.vlgmr.msra.gmra.mxu1 %vm218_vm8, %v566_v42 }
 0x5c6   :  { %834 = vmatpush.msrb.mxu1 %v803_v8 }
 0x5c8   :  { %835 = vmatpush.msrb.mxu1 %v802_v9 }
 0x5ca   :  { %836 = vmatpush.msrb.mxu1 %v801_v10 }
 0x627   :  { %v700_v19 = vpop.f32.mrf.mxu3 }
 0x628   :  { %936 = vmatmul.msk.f32.vlgmr.msrb.gmra.mxu0 %vm218_vm8, %v700_v19 }
 0x62d   :  { %v569_v43 = vpop.f32.mrf.mxu0 }
 0x62e   :  { %929 = vmatmul.msk.f32.gmra.mxu1 %vm218_vm8, %v569_v43 }
 0x62f   :  { %v703_v44 = vpop.f32.mrf.mxu3 }
 0x630   :  { %937 = vmatmul.msk.f32.gmra.mxu0 %vm218_vm8, %v703_v44 }
 0x632   :  { %v435_v46 = vpop.f32.mrf.mxu1 }
 0x633   :  { %v469_v49 = vadd.f32 %v1244_v20, %v435_v46 }
 0x63a   :  { %v438_v47 = vpop.f32.mrf.mxu1 }
 0x63b   :  { %v472_v54 = vadd.f32 %v1246_v25, %v438_v47 }
 0x642   :  { %v600_v48 = vpop.f32.mrf.mxu1 }
 0x643   :  { %v606_v50 = vadd.f32 %v600_v48, %v469_v49  ;;  %v808_v49 = vld [vmem:[%s1363_s2 + $0x50] sm:$0xff] }
 0x644   :  { %870 = vmatpush.msrb.mxu2 %v808_v49 }
 0x6a5   :  { %v732_v29 = vpop.f32.mrf.mxu0 }
 0x6a6   :  { %v738_v52 = vadd.f32 %v732_v29, %v606_v50  ;;  %v807_v50 = vld [vmem:[%s1363_s2 + $0x48] sm:$0xff]  ;;  %v806_v29 = vld [vmem:[%s1363_s2 + $0x40] sm:$0xff] }
 0x6a7   :  { %871 = vmatpush.msrb.mxu2 %v807_v50 }
 0x6a8   :  { %v743_v26 = vadd.f32 %v741_v51, %v738_v52 }
 0x6a9   :  { %872 = vmatpush.msrb.mxu2 %v806_v29 }
 0x6aa   :  { %v1290_v53 = vadd.f32 %v743_v26, %v1092_v0 }
 0x6ab   :  { %v603_v55 = vpop.f32.mrf.mxu1 }
 0x6ac   :  { %v747_v56 = vsel %vm20_vm0, %v1290_v53, 0.0  ;;  %v607_v57 = vadd.f32 %v603_v55, %v472_v54 }
 0x6ad   :  { %v735_v59 = vpop.f32.mrf.mxu0  ;;  %748 = vadd.xlane.f32.xlu2 %v747_v56 }
 0x6ae   :  { %v739_v60 = vadd.f32 %v735_v59, %v607_v57 }
 0x6b0   :  { %v744_v61 = vadd.f32 %v741_v51, %v739_v60 }
 0x6b2   :  { %v1296_v20 = vadd.f32 %v744_v61, %v1099_v2 }
 0x6b4   :  { %v750_v24 = vsel %vm20_vm0, %v1296_v20, 0.0 }
 0x6b5   :  { %751 = vadd.xlane.f32.xlu0 %v750_v24 }
 0x6c9   :  { %791 = vrot.lane.b32.xlu0 %v1106_v7, %s1058_s26 }
 0x720   :  { %v749_v0 = vpop.xlane.xlu2 %748 }
 0x721   :  { %v753_v25 = vmul.f32 %v749_v0, %v1110_v11 }
 0x723   :  { %v755_v58 = vsub.f32 %v1290_v53, %v753_v25 }
 0x725   :  { %v757_v62 = vmul.f32 %v755_v58, %v755_v58 }
 0x727   :  { %v759_v63 = vsel %vm20_vm0, %v757_v62, 0.0 }
 0x728   :  { %760 = vadd.xlane.f32.xlu1 %v759_v63  ;;  %v752_v1 = vpop.xlane.xlu0 %751 }
 0x729   :  { %v754_v2 = vmul.f32 %v752_v1, %v1110_v11 }
 0x72b   :  { %v756_v3 = vsub.f32 %v1296_v20, %v754_v2 }
 0x72d   :  { %v758_v4 = vmul.f32 %v756_v3, %v756_v3 }
 0x72f   :  { %v762_v5 = vsel %vm20_vm0, %v758_v4, 0.0 }
 0x730   :  { %763 = vadd.xlane.f32.xlu2 %v762_v5 }
 0x73b   :  { %v792_v36 = vpop.permute.xlu0 %791 }
 0x741   :  { %847 = vrot.lane.b32.xlu1 %v987_v16, %s1058_s26 }
 0x748   :  { %796 = vrot.lane.b32.xlu2 %v1106_v7, %s1063_s9  ;;  %s1066_s9 = smov [#allocation2]  }
 0x749   :  { %s888_s10 = sshll.u32 %s1066_s9, 4  ;;  %s889_s10 = int_to_ptr.vmem [resolvable:$true] %s888_s10 }
 0x79b   :  { %v761_v7 = vpop.xlane.xlu1 %760 }
 0x79c   :  { %v765_v12 = vmul.f32 %v761_v7, %v1110_v11 }
 0x79e   :  { %v767_v13 = vadd.f32 1e-05, %v765_v12 }
 0x7a0   :  { %1026 = vrsqrt.f32 %v767_v13  ;;  %vm775_vm13 = vweird.f32 %v767_v13 }
 0x7a3   :  { %v764_v18 = vpop.xlane.xlu2 %763 }
 0x7a4   :  { %v766_v21 = vmul.f32 %v764_v18, %v1110_v11 }
 0x7a6   :  { %v1027_v45 = vpop.eup %1026  ;;  %v768_v30 = vadd.f32 1e-05, %v766_v21 }
 0x7a7   :  { %v770_v28 = vmul.f32 %v1027_v45, %v767_v13  ;;  %vm776_vm12 = vweird.f32 %v1027_v45 }
 0x7a8   :  { %1028 = vrsqrt.f32 %v768_v30  ;;  %vm777_vm14 = vmor %vm775_vm13, %vm776_vm12  ;;  %vm785_vm1 = vweird.f32 %v768_v30 }
 0x7a9   :  { %v771_v32 = vmul.f32 %v1027_v45, %v770_v28 }
 0x7ab   :  { %v772_v33 = vmul.f32 0.5, %v771_v32  ;;  %v797_v39 = vpop.permute.xlu2 %796 }
 0x7ad   :  { %v773_v34 = vsub.f32 1.5, %v772_v33 }
 0x7ae   :  { %v1029_v11 = vpop.eup %1028 }
 0x7af   :  { %v774_v35 = vmul.f32 %v1027_v45, %v773_v34  ;;  %v780_v22 = vmul.f32 %v1029_v11, %v768_v30  ;;  %vm786_vm15 = vweird.f32 %v1029_v11 }
 0x7b0   :  { %vm787_vm2 = vmor %vm785_vm1, %vm786_vm15 }
 0x7b1   :  { %v778_v23 = vsel %vm777_vm14, %v1027_v45, %v774_v35  ;;  %v781_v37 = vmul.f32 %v1029_v11, %v780_v22 }
 0x7b2   :  { %v789_v38 = vmul.f32 %v778_v23, %v755_v58 }
 0x7b3   :  { %v782_v40 = vmul.f32 0.5, %v781_v37  ;;  %v848_v57 = vpop.permute.xlu1 %847 }
 0x7b4   :  { %v794_v41 = vmul.f32 %v792_v36, %v789_v38 }
 0x7b5   :  { %v783_v42 = vsub.f32 1.5, %v782_v40 }
 0x7b6   :  { %v799_v19 = vadd.f32 %v797_v39, %v794_v41 }
 0x7b7   :  { %v784_v43 = vmul.f32 %v1029_v11, %v783_v42 }
 0x7b8   :  { %938 = vmatmul.msk.f32.vlgmr.msrb.gmra.mxu1 %vm20_vm0, %v799_v19 }
 0x7b9   :  { %v788_v44 = vsel %vm787_vm2, %v1029_v11, %v784_v43 }
 0x7ba   :  { %v790_v46 = vmul.f32 %v788_v44, %v756_v3 }
 0x7bc   :  { %v795_v47 = vmul.f32 %v792_v36, %v790_v46 }
 0x7be   :  { %v800_v48 = vadd.f32 %v797_v39, %v795_v47 }
 0x7c0   :  { %939 = vmatmul.msk.f32.gmra.mxu1 %vm20_vm0, %v800_v48 }
 0x835   :  { %v838_v51 = vpop.f32.mrf.mxu1 }
 0x836   :  { %v839_v52 = vadd.f32 %v987_v16, %v838_v51 }
 0x838   :  { %v844_v26 = vmax.f32 %v839_v52, 0.0 }
 0x83a   :  { %940 = vmatmul.msk.f32.vlgmr.msrb.gmra.mxu2 %vm850_vm3, %v844_v26 }
 0x83d   :  { %v841_v54 = vpop.f32.mrf.mxu1 }
 0x83e   :  { %v842_v55 = vadd.f32 %v987_v16, %v841_v54 }
 0x840   :  { %v845_v56 = vmax.f32 %v842_v55, 0.0 }
 0x842   :  { %941 = vmatmul.msk.f32.gmra.mxu2 %vm850_vm3, %v845_v56 }
 0x8bd   :  { %v874_v59 = vpop.f32.mrf.mxu2 }
 0x8be   :  { %v875_v60 = vadd.f32 %v874_v59, %v848_v57 }
 0x8c0   :  { %v880_v61 = vadd.f32 %v875_v60, %v1290_v53 }
 0x8c2   :  { %882 = vst.msk [vmem:[#allocation2] sm:$0xff] %vm20_vm0, %v880_v61 }
 0x8c5   :  { %v877_v24 = vpop.f32.mrf.mxu2 }
 0x8c6   :  { %v878_v0 = vadd.f32 %v877_v24, %v848_v57 }
 0x8c8   :  { %v881_v25 = vadd.f32 %v878_v0, %v1296_v20 }
 0x8ca   :  { %883 = vst.msk [vmem:[#allocation2 + $0x8] sm:$0xff] %vm20_vm0, %v881_v25 }
 0x8cb   :  { %896 = dma.vmem_to_hbm [thread:$0]  %s889_s10, 256, %s891_s12, [#allocation3], %s1067_s13, %s1067_s13, %s1068_s14  }
 0x8cc   :  { %1054 = dma.done.wait [#allocation3], 256  }
 0x8cd   :  { %1055 = vsyncadd [#allocation3], 4294967040 }
 0x8ce   :  { %901 = vsyncpa [#allocation3], 1 }

</bundles_post_ra>
